<compile_context>
chip_gen: v7x
topology: tpu7x:2x2x1
jax: 0.10.0
libtpu: 0.0.40
codegen_flags: <defaults>
</compile_context>

<pallas_src>
import jax
import jax.numpy as jnp
from jax.experimental import pallas as pl
from jax.experimental.pallas import tpu as pltpu

_LANE = 128
_SUBLANE = 8


def _round_up(x, m):
    return (x + m - 1) // m * m


def _mlp_kernel(x_ref, w1_ref, b1_ref, w2_ref, b2_ref, w3_ref, b3_ref, o_ref):
    # layer1 + ReLU (MXU matmul, f32 accumulate; bias+relu on VPU)
    h1 = jnp.dot(x_ref[...], w1_ref[...], preferred_element_type=jnp.float32)
    h1 = jnp.maximum(h1 + b1_ref[...], 0.0)
    # layer2 + ReLU
    h2 = jnp.dot(h1, w2_ref[...], preferred_element_type=jnp.float32)
    h2 = jnp.maximum(h2 + b2_ref[...], 0.0)
    # layer3 (no activation)
    out = jnp.dot(h2, w3_ref[...], preferred_element_type=jnp.float32) + b3_ref[...]
    o_ref[...] = out.astype(o_ref.dtype)


def simple_model_linear(x, params, *, batch_tile=None):
    """Fused 3-layer MLP forward. x: (B, input_dim) float32."""
    w1, b1, w2, b2, w3, b3 = params
    B, in_dim = x.shape
    hid = w1.shape[1]
    out_dim = w3.shape[1]

    # ---- lane-align only the (tiny) final projection: 10 -> 128 ----
    out_pad = _round_up(out_dim, _LANE)
    if out_pad != out_dim:
        w3 = jnp.pad(w3, ((0, 0), (0, out_pad - out_dim)))
        b3 = jnp.pad(b3, ((0, 0), (0, out_pad - out_dim)))

    # ---- batch tiling ----
    if batch_tile is None:
        batch_tile = 512                      # big M keeps the MXU fed
    batch_tile = min(batch_tile, _round_up(B, _SUBLANE))
    batch_tile = max(_SUBLANE, _round_up(batch_tile, _SUBLANE))

    if B <= batch_tile:
        # Single grid step; pad the (few) missing rows — cheap for small B.
        rows = batch_tile
        if rows != B:
            x = jnp.pad(x, ((0, rows - B), (0, 0)))
        grid = (1,)
    else:
        # Multi-step: no copy of x.  Pallas pads the partial last block on
        # reads and masks its out-of-bounds writes (rows are independent).
        rows = B
        grid = (pl.cdiv(B, batch_tile),)

    flops = 2 * B * (in_dim * hid + hid * hid + hid * out_pad)
    bytes_accessed = 4 * (
        B * in_dim                                   # x
        + in_dim * hid + hid * hid + hid * out_pad   # weights
        + 2 * hid + out_pad                          # biases
        + B * out_pad                                # output
    )

    out_padded = pl.pallas_call(
        _mlp_kernel,
        out_shape=jax.ShapeDtypeStruct((rows, out_pad), x.dtype),
        grid_spec=pltpu.PrefetchScalarGridSpec(
            num_scalar_prefetch=0,
            grid=grid,
            in_specs=[
                # x: tiled over the batch; last dim = full array dim (784)
                pl.BlockSpec((batch_tile, in_dim), lambda i: (i, 0)),
                # weights / biases: full blocks, resident across the grid
                pl.BlockSpec((in_dim, hid), lambda i: (0, 0)),
                pl.BlockSpec((1, hid), lambda i: (0, 0)),
                pl.BlockSpec((hid, hid), lambda i: (0, 0)),
                pl.BlockSpec((1, hid), lambda i: (0, 0)),
                pl.BlockSpec((hid, out_pad), lambda i: (0, 0)),
                pl.BlockSpec((1, out_pad), lambda i: (0, 0)),
            ],
            out_specs=pl.BlockSpec((batch_tile, out_pad), lambda i: (i, 0)),
        ),
        compiler_params=pltpu.CompilerParams(
            dimension_semantics=("parallel",),
            vmem_limit_bytes=32 * 1024 * 1024,
        ),
        cost_estimate=pl.CostEstimate(
            flops=flops, transcendentals=0, bytes_accessed=bytes_accessed
        ),
    )(x, w1, b1, w2, b2, w3, b3)

    return out_padded[:B, :out_dim]


def init_params(key, input_dim=784, hidden_dim=256, output_dim=10, dtype=jnp.float32):
    """Deterministic init mimicking nn.Linear's U(-1/sqrt(fan_in), 1/sqrt(fan_in))."""
    ks = jax.random.split(key, 6)

    def linear(kw, kb, fan_in, fan_out):
        bound = 1.0 / jnp.sqrt(fan_in)
        # store weight as (in, out) == PyTorch (out, in) transposed
        w = jax.random.uniform(kw, (fan_in, fan_out), dtype, -bound, bound)
        b = jax.random.uniform(kb, (1, fan_out), dtype, -bound, bound)
        return w, b

    w1, b1 = linear(ks[0], ks[1], input_dim, hidden_dim)
    w2, b2 = linear(ks[2], ks[3], hidden_dim, hidden_dim)
    w3, b3 = linear(ks[4], ks[5], hidden_dim, output_dim)
    return (w1, b1, w2, b2, w3, b3)


def _reference(x, params):
    w1, b1, w2, b2, w3, b3 = params
    h1 = jnp.maximum(x @ w1 + b1, 0.0)
    h2 = jnp.maximum(h1 @ w2 + b2, 0.0)
    return h2 @ w3 + b3


if __name__ == "__main__":
    key = jax.random.PRNGKey(0)
    k_x, k_p = jax.random.split(key)

    input_dim, hidden_dim, output_dim = 784, 256, 10
    batch = 12  # small; exercises the row-padding path (12 -> 16)

    x = jax.random.normal(k_x, (batch, input_dim), dtype=jnp.float32)
    params = init_params(k_p, input_dim, hidden_dim, output_dim)

    fwd = jax.jit(lambda xx: simple_model_linear(xx, params))
    out = jax.block_until_ready(fwd(x))

    ref = _reference(x, params)
    assert out.shape == (batch, output_dim)
    assert jnp.allclose(out, ref, atol=1e-3, rtol=1e-3), "mismatch vs reference"

    print("KERNEL_OK")
</pallas_src>

<mosaic_0001>
module attributes {stable_mosaic.version = 11 : i64} {
  func.func @_mlp_kernel(%arg0: i32, %arg1: memref<16x784xf32, #tpu.memory_space<vmem>>, %arg2: memref<784x256xf32, #tpu.memory_space<vmem>>, %arg3: memref<1x256xf32, #tpu.memory_space<vmem>>, %arg4: memref<256x256xf32, #tpu.memory_space<vmem>>, %arg5: memref<1x256xf32, #tpu.memory_space<vmem>>, %arg6: memref<256x128xf32, #tpu.memory_space<vmem>>, %arg7: memref<1x128xf32, #tpu.memory_space<vmem>>, %arg8: memref<16x128xf32, #tpu.memory_space<vmem>>) attributes {dimension_semantics = [#tpu.dimension_semantics<parallel>], iteration_bounds = array<i64: 1>, scalar_prefetch = 0 : i64, scratch_operands = 0 : i64, tpu.core_type = #tpu.core_type<tc>, window_params = [{transform_indices = @transform_0, window_bounds = array<i64: 16, 784>}, {pipeline_mode = #tpu.pipeline_mode<synchronous>, transform_indices = @transform_1, window_bounds = array<i64: 784, 256>}, {pipeline_mode = #tpu.pipeline_mode<synchronous>, transform_indices = @transform_2, window_bounds = array<i64: 1, 256>}, {pipeline_mode = #tpu.pipeline_mode<synchronous>, transform_indices = @transform_3, window_bounds = array<i64: 256, 256>}, {pipeline_mode = #tpu.pipeline_mode<synchronous>, transform_indices = @transform_4, window_bounds = array<i64: 1, 256>}, {pipeline_mode = #tpu.pipeline_mode<synchronous>, transform_indices = @transform_5, window_bounds = array<i64: 256, 128>}, {pipeline_mode = #tpu.pipeline_mode<synchronous>, transform_indices = @transform_6, window_bounds = array<i64: 1, 128>}, {transform_indices = @transform_7, window_bounds = array<i64: 16, 128>}]} {
    %c0 = arith.constant 0 : index
    %c0_0 = arith.constant 0 : index
    %0 = vector.load %arg1[%c0, %c0_0] : memref<16x784xf32, #tpu.memory_space<vmem>>, vector<16x784xf32>
    %c0_1 = arith.constant 0 : index
    %c0_2 = arith.constant 0 : index
    %1 = vector.load %arg2[%c0_1, %c0_2] : memref<784x256xf32, #tpu.memory_space<vmem>>, vector<784x256xf32>
    %cst = arith.constant dense<0.000000e+00> : vector<16x256xf32>
    %2 = tpu.matmul %0, %1, %cst {dimension_numbers = #tpu.dot_dimension_numbers<[1], [0], [0], [1], [0, 0, 1, 1], [], []>} : vector<16x784xf32>, vector<784x256xf32>, vector<16x256xf32> -> vector<16x256xf32>
    %c0_3 = arith.constant 0 : index
    %c0_4 = arith.constant 0 : index
    %3 = vector.load %arg3[%c0_3, %c0_4] : memref<1x256xf32, #tpu.memory_space<vmem>>, vector<1x256xf32>
    %4 = vector.broadcast %3 : vector<1x256xf32> to vector<16x256xf32>
    %5 = arith.addf %2, %4 : vector<16x256xf32>
    %cst_5 = arith.constant 0.000000e+00 : f32
    %6 = vector.broadcast %cst_5 : f32 to vector<16x256xf32>
    %7 = arith.maximumf %5, %6 : vector<16x256xf32>
    %c0_6 = arith.constant 0 : index
    %c0_7 = arith.constant 0 : index
    %8 = vector.load %arg4[%c0_6, %c0_7] : memref<256x256xf32, #tpu.memory_space<vmem>>, vector<256x256xf32>
    %cst_8 = arith.constant dense<0.000000e+00> : vector<16x256xf32>
    %9 = tpu.matmul %7, %8, %cst_8 {dimension_numbers = #tpu.dot_dimension_numbers<[1], [0], [0], [1], [0, 0, 1, 1], [], []>} : vector<16x256xf32>, vector<256x256xf32>, vector<16x256xf32> -> vector<16x256xf32>
    %c0_9 = arith.constant 0 : index
    %c0_10 = arith.constant 0 : index
    %10 = vector.load %arg5[%c0_9, %c0_10] : memref<1x256xf32, #tpu.memory_space<vmem>>, vector<1x256xf32>
    %11 = vector.broadcast %10 : vector<1x256xf32> to vector<16x256xf32>
    %12 = arith.addf %9, %11 : vector<16x256xf32>
    %cst_11 = arith.constant 0.000000e+00 : f32
    %13 = vector.broadcast %cst_11 : f32 to vector<16x256xf32>
    %14 = arith.maximumf %12, %13 : vector<16x256xf32>
    %c0_12 = arith.constant 0 : index
    %c0_13 = arith.constant 0 : index
    %15 = vector.load %arg6[%c0_12, %c0_13] : memref<256x128xf32, #tpu.memory_space<vmem>>, vector<256x128xf32>
    %cst_14 = arith.constant dense<0.000000e+00> : vector<16x128xf32>
    %16 = tpu.matmul %14, %15, %cst_14 {dimension_numbers = #tpu.dot_dimension_numbers<[1], [0], [0], [1], [0, 0, 1, 1], [], []>} : vector<16x256xf32>, vector<256x128xf32>, vector<16x128xf32> -> vector<16x128xf32>
    %c0_15 = arith.constant 0 : index
    %c0_16 = arith.constant 0 : index
    %17 = vector.load %arg7[%c0_15, %c0_16] : memref<1x128xf32, #tpu.memory_space<vmem>>, vector<1x128xf32>
    %18 = vector.broadcast %17 : vector<1x128xf32> to vector<16x128xf32>
    %19 = arith.addf %16, %18 : vector<16x128xf32>
    %c0_17 = arith.constant 0 : index
    %c0_18 = arith.constant 0 : index
    %20 = vector.load %arg8[%c0_17, %c0_18] : memref<16x128xf32, #tpu.memory_space<vmem>>, vector<16x128xf32>
    tpu.vector_store %arg8[%c0_17, %c0_18], %19 {strides = array<i32>} : memref<16x128xf32, #tpu.memory_space<vmem>>, vector<16x128xf32>,
    return
  }
  func.func @transform_0(%arg0: i32) -> (i32, i32) {
    %c0_i32 = arith.constant 0 : i32
    %c0_i32_0 = arith.constant 0 : i32
    return %arg0, %c0_i32 : i32, i32
  }
  func.func @transform_1(%arg0: i32) -> (i32, i32) {
    %c0_i32 = arith.constant 0 : i32
    %c0_i32_0 = arith.constant 0 : i32
    %c0_i32_1 = arith.constant 0 : i32
    return %c0_i32, %c0_i32_0 : i32, i32
  }
  func.func @transform_2(%arg0: i32) -> (i32, i32) {
    %c0_i32 = arith.constant 0 : i32
    %c0_i32_0 = arith.constant 0 : i32
    %c0_i32_1 = arith.constant 0 : i32
    return %c0_i32, %c0_i32_0 : i32, i32
  }
  func.func @transform_3(%arg0: i32) -> (i32, i32) {
    %c0_i32 = arith.constant 0 : i32
    %c0_i32_0 = arith.constant 0 : i32
    %c0_i32_1 = arith.constant 0 : i32
    return %c0_i32, %c0_i32_0 : i32, i32
  }
  func.func @transform_4(%arg0: i32) -> (i32, i32) {
    %c0_i32 = arith.constant 0 : i32
    %c0_i32_0 = arith.constant 0 : i32
    %c0_i32_1 = arith.constant 0 : i32
    return %c0_i32, %c0_i32_0 : i32, i32
  }
  func.func @transform_5(%arg0: i32) -> (i32, i32) {
    %c0_i32 = arith.constant 0 : i32
    %c0_i32_0 = arith.constant 0 : i32
    %c0_i32_1 = arith.constant 0 : i32
    return %c0_i32, %c0_i32_0 : i32, i32
  }
  func.func @transform_6(%arg0: i32) -> (i32, i32) {
    %c0_i32 = arith.constant 0 : i32
    %c0_i32_0 = arith.constant 0 : i32
    %c0_i32_1 = arith.constant 0 : i32
    return %c0_i32, %c0_i32_0 : i32, i32
  }
  func.func @transform_7(%arg0: i32) -> (i32, i32) {
    %c0_i32 = arith.constant 0 : i32
    %c0_i32_0 = arith.constant 0 : i32
    return %arg0, %c0_i32 : i32, i32
  }
}

</mosaic_0001>

<bundles_post_ra>
// kernel: _lambda_.1
= control target key start
LH: loop header
LB: loop body
LE: loop exit
PB: predicated region body
PF: predicated region fallthrough
CT: control target
= control target key end

     0   :  { %12 = vsyncpa [#allocation3], 0  ;;  %s1525_s0 = inlined_call_operand.vmem [shape: f32[16,784], index: 0, kind: input, shape index: {}]   ;;  %s1526_s1 = inlined_call_operand.hbm [shape: f32[784,256], index: 1, kind: input, shape index: {}]   ;;  %s1527_s2 = inlined_call_operand.vmem [shape: f32[1,256], index: 2, kind: input, shape index: {}]   ;;  %s1528_s3 = inlined_call_operand.hbm [shape: f32[256,256], index: 3, kind: input, shape index: {}]   ;;  %s1529_s4 = inlined_call_operand.vmem [shape: f32[1,256], index: 4, kind: input, shape index: {}]   ;;  %s1530_s5 = inlined_call_operand.hbm [shape: f32[256,128], index: 5, kind: input, shape index: {}]   ;;  %s1531_s6 = inlined_call_operand.vmem [shape: f32[1,128], index: 6, kind: input, shape index: {}]   ;;  %s1532_s7 = inlined_call_operand.hbm [shape: f32[16,128], index: 7, kind: output, shape index: {}]  }
   0x1   :  { %13 = vsyncpa [#allocation6], 0 }
   0x2   :  { %14 = vsyncpa [#allocation4], 0  ;;  %s1352_s24 = smov [#allocation5]   ;;  %s1353_s26 = smov [#allocation2]  }
   0x3   :  { %s36_s25 = sshll.u32 %s1352_s24, 4  ;;  %s22_s27 = sshll.u32 %s1353_s26, 4  ;;  %s37_s25 = int_to_ptr.vmem [resolvable:$true] %s36_s25  ;;  %s1401_s27 = int_to_ptr.vmem [resolvable:$true] %s22_s27 }
   0x4   :  { %s1258_s30 = scalar_lea.hbm %s1528_s3, 8192 }
   0x5   :  { %p1259_p0 = scmp.ne.s32.totalorder %s1528_s3, %s1258_s30  ;;  %p1262_p1 = scmp.lt.u32.totalorder %s1258_s30, %s1528_s3 }
   0x7   :  { %p1264_p2 = pnand %p1262_p1, %p1259_p0 }
   0x9   :  { %1267 = shalt.err (!%p1264_p2)
}
   0xa   :  { %s1268_s12 = scalar_lea.vmem %s37_s25, 8192  ;;  %p1273_p4 = scmp.lt.s32.totalorder %s37_s25, %s37_s25 }
   0xb   :  { %p1269_p3 = scmp.ne.s32.totalorder %s37_s25, %s1268_s12  ;;  %p1274_p5 = scmp.lt.s32.totalorder %s1268_s12, %s1268_s12 }
   0xd   :  { %p1275_p6 = por %p1274_p5, %p1273_p4 }
   0xf   :  { %p1276_p7 = pnand %p1275_p6, %p1269_p3 }
  0x11   :  { %1279 = shalt.err (!%p1276_p7)
}
  0x12   :  { %s1354_s13 = smov 256   ;;  %s1355_s14 = smov 16  }
  0x13   :  { %42 = dma.hbm_to_vmem [thread:$0]  %s1528_s3, 8192, %s37_s25, [#allocation6], %s1354_s13, %s1354_s13, %s1355_s14  }
  0x14   :  { %s1280_s19 = scalar_lea.hbm %s1526_s1, 25088 }
  0x15   :  { %p1281_p8 = scmp.ne.s32.totalorder %s1526_s1, %s1280_s19  ;;  %p1284_p9 = scmp.lt.u32.totalorder %s1280_s19, %s1526_s1 }
  0x17   :  { %p1286_p10 = pnand %p1284_p9, %p1281_p8 }
  0x19   :  { %1289 = shalt.err (!%p1286_p10)
}
  0x1a   :  { %s1290_s24 = scalar_lea.vmem %s1401_s27, 25088  ;;  %p1295_p12 = scmp.lt.s32.totalorder %s1401_s27, %s1401_s27 }
  0x1b   :  { %p1291_p11 = scmp.ne.s32.totalorder %s1401_s27, %s1290_s24  ;;  %p1296_p13 = scmp.lt.s32.totalorder %s1290_s24, %s1290_s24 }
  0x1d   :  { %p1297_p0 = por %p1296_p13, %p1295_p12 }
  0x1f   :  { %p1298_p1 = pnand %p1297_p0, %p1291_p11 }
  0x21   :  { %1301 = shalt.err (!%p1298_p1)
}
  0x22   :  { %28 = dma.hbm_to_vmem [thread:$0]  %s1526_s1, 25088, %s1401_s27, [#allocation3], %s1354_s13, %s1354_s13, %s1355_s14  }
  0x23   :  { %s1356_s26 = smov [#allocation7]   ;;  %s1302_s8 = scalar_lea.hbm %s1530_s5, 4096 }
  0x24   :  { %s50_s28 = sshll.u32 %s1356_s26, 4  ;;  %p1303_p2 = scmp.ne.s32.totalorder %s1530_s5, %s1302_s8  ;;  %s51_s28 = int_to_ptr.vmem [resolvable:$true] %s50_s28 }
  0x25   :  { %p1306_p3 = scmp.lt.u32.totalorder %s1302_s8, %s1530_s5 }
  0x27   :  { %p1308_p4 = pnand %p1306_p3, %p1303_p2 }
  0x29   :  { %1311 = shalt.err (!%p1308_p4)
}
  0x2a   :  { %s1312_s15 = scalar_lea.vmem %s51_s28, 4096  ;;  %p1317_p6 = scmp.lt.s32.totalorder %s51_s28, %s51_s28 }
  0x2b   :  { %p1313_p5 = scmp.ne.s32.totalorder %s51_s28, %s1312_s15  ;;  %p1318_p7 = scmp.lt.s32.totalorder %s1312_s15, %s1312_s15 }
  0x2d   :  { %p1319_p8 = por %p1318_p7, %p1317_p6 }
  0x2f   :  { %p1320_p9 = pnand %p1319_p8, %p1313_p5 }
  0x31   :  { %1323 = shalt.err (!%p1320_p9)
}
  0x32   :  { %s1357_s1 = smov 128   ;;  %s1358_s27 = smov 8  }
  0x33   :  { %56 = dma.hbm_to_vmem [thread:$0]  %s1530_s5, 4096, %s51_s28, [#allocation6], %s1357_s1, %s1357_s1, %s1358_s27  }
  0x34   :  { %1346 = dma.done.wait [#allocation3], 25088  }
  0x35   :  { %1347 = vsyncadd [#allocation3], 4294942208 }
  0x36   :  { %1348 = dma.done.wait [#allocation6], 12288  }
  0x37   :  { %1349 = vsyncadd [#allocation6], 4294955008  ;;  %v147_v0 = vld [vmem:[#allocation2 + $0x208] sm:$0xff]  ;;  %v149_v1 = vld [vmem:[#allocation2 + $0x218] sm:$0xff]  ;;  %vm290_vm0 = vcmask 130048   ;;  %s1360_s22 = smov [#allocation8]  }
  0x38   :  { %v146_v2 = vld [vmem:[#allocation2 + $0x200] sm:$0xff]  ;;  %v1005_v3 = vpack.c.bf16 %v149_v1, %v147_v0  ;;  %v148_v4 = vld [vmem:[#allocation2 + $0x210] sm:$0xff]  ;;  %v151_v5 = vld [vmem:[#allocation2 + $0x228] sm:$0xff]  ;;  %s887_s23 = sshll.u32 %s1360_s22, 4  ;;  %s888_s23 = int_to_ptr.vmem [resolvable:$true] %s887_s23 }
  0x39   :  { %v153_v6 = vld [vmem:[#allocation2 + $0x238] sm:$0xff]  ;;  %v1007_v7 = vpack.c.bf16 %v148_v4, %v146_v2  ;;  %v150_v9 = vld [vmem:[#allocation2 + $0x220] sm:$0xff]  ;;  %v152_v10 = vld [vmem:[#allocation2 + $0x230] sm:$0xff]  ;;  %s1324_s24 = scalar_lea.vmem %s888_s23, 256  ;;  %p1329_p11 = scmp.lt.s32.totalorder %s888_s23, %s888_s23 }
  0x3a   :  { %v1009_v8 = vpack.c.bf16 %v153_v6, %v151_v5  ;;  %v155_v11 = vld [vmem:[#allocation2 + $0x248] sm:$0xff]  ;;  %1006 = vmatprep.subr.bf16.mxu0 %v1005_v3  ;;  %v157_v12 = vld [vmem:[#allocation2 + $0x258] sm:$0xff]  ;;  %v1011_v13 = vpack.c.bf16 %v152_v10, %v150_v9  ;;  %v154_v15 = vld [vmem:[#allocation2 + $0x240] sm:$0xff]  ;;  %p1325_p10 = scmp.ne.s32.totalorder %s888_s23, %s1324_s24  ;;  %p1330_p12 = scmp.lt.s32.totalorder %s1324_s24, %s1324_s24 }
  0x3b   :  { %1008 = vmatpush1.bf16.msra.mxu0 %v1007_v7  ;;  %v1013_v14 = vpack.c.bf16 %v157_v12, %v155_v11  ;;  %v156_v16 = vld [vmem:[#allocation2 + $0x250] sm:$0xff]  ;;  %v159_v17 = vld [vmem:[#allocation2 + $0x268] sm:$0xff]  ;;  %v161_v18 = vld [vmem:[#allocation2 + $0x278] sm:$0xff] }
  0x3c   :  { %1010 = vmatprep.subr.bf16.mxu0 %v1009_v8  ;;  %v1015_v19 = vpack.c.bf16 %v156_v16, %v154_v15  ;;  %v1017_v20 = vpack.c.bf16 %v161_v18, %v159_v17  ;;  %v158_v21 = vld [vmem:[#allocation2 + $0x260] sm:$0xff]  ;;  %v160_v22 = vld [vmem:[#allocation2 + $0x270] sm:$0xff]  ;;  %v163_v23 = vld [vmem:[#allocation2 + $0x288] sm:$0xff]  ;;  %p1331_p13 = por %p1330_p12, %p1329_p11 }
  0x3d   :  { %v165_v24 = vld [vmem:[#allocation2 + $0x298] sm:$0xff]  ;;  %v1019_v25 = vpack.c.bf16 %v160_v22, %v158_v21  ;;  %v162_v27 = vld [vmem:[#allocation2 + $0x280] sm:$0xff]  ;;  %v164_v28 = vld [vmem:[#allocation2 + $0x290] sm:$0xff] }
  0x3e   :  { %v1021_v26 = vpack.c.bf16 %v165_v24, %v163_v23  ;;  %v167_v29 = vld [vmem:[#allocation2 + $0x2a8] sm:$0xff]  ;;  %v169_v30 = vld [vmem:[#allocation2 + $0x2b8] sm:$0xff]  ;;  %v1023_v31 = vpack.c.bf16 %v164_v28, %v162_v27  ;;  %v166_v33 = vld [vmem:[#allocation2 + $0x2a0] sm:$0xff]  ;;  %p1332_p0 = pnand %p1331_p13, %p1325_p10 }
  0x3f   :  { %1012 = vmatpush1.bf16.msra.mxu0 %v1011_v13  ;;  %v1025_v32 = vpack.c.bf16 %v169_v30, %v167_v29  ;;  %v168_v34 = vld [vmem:[#allocation2 + $0x2b0] sm:$0xff]  ;;  %v171_v35 = vld [vmem:[#allocation2 + $0x2c8] sm:$0xff]  ;;  %v173_v36 = vld [vmem:[#allocation2 + $0x2d8] sm:$0xff] }
  0x40   :  { %1014 = vmatprep.subr.bf16.mxu0 %v1013_v14  ;;  %v1027_v37 = vpack.c.bf16 %v168_v34, %v166_v33  ;;  %v1029_v38 = vpack.c.bf16 %v173_v36, %v171_v35  ;;  %v170_v39 = vld [vmem:[#allocation2 + $0x2c0] sm:$0xff]  ;;  %v172_v40 = vld [vmem:[#allocation2 + $0x2d0] sm:$0xff]  ;;  %v71_v41 = vld [vmem:[%s1525_s0 + $0x18] sm:$0xff] }
  0x41   :  { %v175_v42 = vld [vmem:[#allocation2 + $0x2e8] sm:$0xff]  ;;  %v177_v43 = vld [vmem:[#allocation2 + $0x2f8] sm:$0xff]  ;;  %438 = vmatprep.mubr.f32.mxu0 %v71_v41  ;;  %v1031_v44 = vpack.c.bf16 %v172_v40, %v170_v39  ;;  %v174_v45 = vld [vmem:[#allocation2 + $0x2e0] sm:$0xff] }
  0x42   :  { %v176_v46 = vld [vmem:[#allocation2 + $0x2f0] sm:$0xff]  ;;  %v83_v47 = vld [vmem:[#allocation2 + $0x8] sm:$0xff]  ;;  %v1033_v48 = vpack.c.bf16 %v177_v43, %v175_v42  ;;  %v85_v49 = vld [vmem:[#allocation2 + $0x18] sm:$0xff] }
  0x43   :  { %1016 = vmatpush1.bf16.msra.mxu0 %v1015_v19  ;;  %v82_v50 = vld [vmem:[#allocation2] sm:$0xff]  ;;  %v84_v51 = vld [vmem:[#allocation2 + $0x10] sm:$0xff]  ;;  %v179_v52 = vld [vmem:[#allocation2 + $0x308] sm:$0xff]  ;;  %v941_v54 = vpack.c.bf16 %v85_v49, %v83_v47  ;;  %v1035_v58 = vpack.c.bf16 %v176_v46, %v174_v45 }
  0x44   :  { %1018 = vmatprep.subr.bf16.mxu0 %v1017_v20  ;;  %v181_v53 = vld [vmem:[#allocation2 + $0x318] sm:$0xff]  ;;  %v943_v55 = vpack.c.bf16 %v84_v51, %v82_v50  ;;  %v87_v56 = vld [vmem:[#allocation2 + $0x28] sm:$0xff]  ;;  %v178_v59 = vld [vmem:[#allocation2 + $0x300] sm:$0xff] }
  0x45   :  { %v89_v57 = vld [vmem:[#allocation2 + $0x38] sm:$0xff]  ;;  %942 = vmatprep.subr.bf16.mxu1 %v941_v54  ;;  %v86_v61 = vld [vmem:[#allocation2 + $0x20] sm:$0xff]  ;;  %v88_v62 = vld [vmem:[#allocation2 + $0x30] sm:$0xff]  ;;  %v1037_v63 = vpack.c.bf16 %v181_v53, %v179_v52 }
  0x46   :  { %v945_v60 = vpack.c.bf16 %v89_v57, %v87_v56  ;;  %v180_v0 = vld [vmem:[#allocation2 + $0x310] sm:$0xff]  ;;  %v183_v1 = vld [vmem:[#allocation2 + $0x328] sm:$0xff]  ;;  %v185_v2 = vld [vmem:[#allocation2 + $0x338] sm:$0xff]  ;;  %944 = vmatpush1.bf16.msra.mxu1 %v943_v55  ;;  %v947_v3 = vpack.c.bf16 %v88_v62, %v86_v61 }
  0x47   :  { %1020 = vmatpush1.bf16.msra.mxu0 %v1019_v25  ;;  %v91_v4 = vld [vmem:[#allocation2 + $0x48] sm:$0xff]  ;;  %v93_v5 = vld [vmem:[#allocation2 + $0x58] sm:$0xff]  ;;  %v90_v6 = vld [vmem:[#allocation2 + $0x40] sm:$0xff]  ;;  %v1039_v9 = vpack.c.bf16 %v180_v0, %v178_v59  ;;  %v1041_v12 = vpack.c.bf16 %v185_v2, %v183_v1 }
  0x48   :  { %1022 = vmatprep.subr.bf16.mxu0 %v1021_v26  ;;  %946 = vmatprep.subr.bf16.mxu1 %v945_v60  ;;  %v949_v7 = vpack.c.bf16 %v93_v5, %v91_v4  ;;  %v92_v8 = vld [vmem:[#allocation2 + $0x50] sm:$0xff]  ;;  %v182_v10 = vld [vmem:[#allocation2 + $0x320] sm:$0xff]  ;;  %v95_v11 = vld [vmem:[#allocation2 + $0x68] sm:$0xff] }
  0x49   :  { %v184_v13 = vld [vmem:[#allocation2 + $0x330] sm:$0xff]  ;;  %v187_v14 = vld [vmem:[#allocation2 + $0x348] sm:$0xff]  ;;  %v951_v15 = vpack.c.bf16 %v92_v8, %v90_v6  ;;  %v97_v16 = vld [vmem:[#allocation2 + $0x78] sm:$0xff] }
  0x4a   :  { %948 = vmatpush1.bf16.msra.mxu1 %v947_v3  ;;  %v189_v17 = vld [vmem:[#allocation2 + $0x358] sm:$0xff]  ;;  %v953_v18 = vpack.c.bf16 %v97_v16, %v95_v11  ;;  %v94_v19 = vld [vmem:[#allocation2 + $0x60] sm:$0xff]  ;;  %v96_v20 = vld [vmem:[#allocation2 + $0x70] sm:$0xff]  ;;  %v1043_v23 = vpack.c.bf16 %v184_v13, %v182_v10 }
  0x4b   :  { %1024 = vmatpush1.bf16.msra.mxu0 %v1023_v31  ;;  %950 = vmatprep.subr.bf16.mxu1 %v949_v7  ;;  %v99_v21 = vld [vmem:[#allocation2 + $0x88] sm:$0xff]  ;;  %v101_v22 = vld [vmem:[#allocation2 + $0x98] sm:$0xff]  ;;  %v1045_v24 = vpack.c.bf16 %v189_v17, %v187_v14  ;;  %v186_v25 = vld [vmem:[#allocation2 + $0x340] sm:$0xff]  ;;  %v955_v28 = vpack.c.bf16 %v96_v20, %v94_v19 }
  0x4c   :  { %1026 = vmatprep.subr.bf16.mxu0 %v1025_v32  ;;  %v188_v26 = vld [vmem:[#allocation2 + $0x350] sm:$0xff]  ;;  %v191_v27 = vld [vmem:[#allocation2 + $0x368] sm:$0xff]  ;;  %v193_v29 = vld [vmem:[#allocation2 + $0x378] sm:$0xff]  ;;  %v957_v30 = vpack.c.bf16 %v101_v22, %v99_v21 }
  0x4d   :  { %v98_v31 = vld [vmem:[#allocation2 + $0x80] sm:$0xff]  ;;  %v100_v32 = vld [vmem:[#allocation2 + $0x90] sm:$0xff]  ;;  %v103_v33 = vld [vmem:[#allocation2 + $0xa8] sm:$0xff]  ;;  %v1047_v35 = vpack.c.bf16 %v188_v26, %v186_v25  ;;  %v1049_v36 = vpack.c.bf16 %v193_v29, %v191_v27 }
  0x4e   :  { %952 = vmatpush1.bf16.msra.mxu1 %v951_v15  ;;  %v105_v34 = vld [vmem:[#allocation2 + $0xb8] sm:$0xff]  ;;  %v195_v39 = vld [vmem:[#allocation2 + $0x388] sm:$0xff]  ;;  %v959_v40 = vpack.c.bf16 %v100_v32, %v98_v31  ;;  %v102_v43 = vld [vmem:[#allocation2 + $0xa0] sm:$0xff] }
  0x4f   :  { %1028 = vmatpush1.bf16.msra.mxu0 %v1027_v37  ;;  %954 = vmatprep.subr.bf16.mxu1 %v953_v18  ;;  %v190_v37 = vld [vmem:[#allocation2 + $0x360] sm:$0xff]  ;;  %v197_v41 = vld [vmem:[#allocation2 + $0x398] sm:$0xff]  ;;  %v961_v42 = vpack.c.bf16 %v105_v34, %v103_v33  ;;  %v107_v45 = vld [vmem:[#allocation2 + $0xc8] sm:$0xff] }
  0x50   :  { %1030 = vmatprep.subr.bf16.mxu0 %v1029_v38  ;;  %v192_v38 = vld [vmem:[#allocation2 + $0x370] sm:$0xff]  ;;  %v109_v46 = vld [vmem:[#allocation2 + $0xd8] sm:$0xff]  ;;  %v194_v49 = vld [vmem:[#allocation2 + $0x380] sm:$0xff] }
  0x51   :  { %v1051_v47 = vpack.c.bf16 %v192_v38, %v190_v37  ;;  %v196_v50 = vld [vmem:[#allocation2 + $0x390] sm:$0xff]  ;;  %v199_v51 = vld [vmem:[#allocation2 + $0x3a8] sm:$0xff]  ;;  %v201_v53 = vld [vmem:[#allocation2 + $0x3b8] sm:$0xff]  ;;  %v965_v54 = vpack.c.bf16 %v109_v46, %v107_v45 }
  0x52   :  { %956 = vmatpush1.bf16.msra.mxu1 %v955_v28  ;;  %v106_v55 = vld [vmem:[#allocation2 + $0xc0] sm:$0xff]  ;;  %v108_v56 = vld [vmem:[#allocation2 + $0xd0] sm:$0xff]  ;;  %v111_v57 = vld [vmem:[#allocation2 + $0xe8] sm:$0xff]  ;;  %v1055_v59 = vpack.c.bf16 %v196_v50, %v194_v49  ;;  %v1057_v60 = vpack.c.bf16 %v201_v53, %v199_v51 }
  0x53   :  { %1032 = vmatpush1.bf16.msra.mxu0 %v1031_v44  ;;  %958 = vmatprep.subr.bf16.mxu1 %v957_v30  ;;  %v104_v44 = vld [vmem:[#allocation2 + $0xb0] sm:$0xff]  ;;  %v198_v61 = vld [vmem:[#allocation2 + $0x3a0] sm:$0xff]  ;;  %v967_v0 = vpack.c.bf16 %v108_v56, %v106_v55  ;;  %v205_v1 = vld [vmem:[#allocation2 + $0x3d8] sm:$0xff] }
  0x54   :  { %1034 = vmatprep.subr.bf16.mxu0 %v1033_v48  ;;  %v1053_v48 = vpack.c.bf16 %v197_v41, %v195_v39  ;;  %v963_v52 = vpack.c.bf16 %v104_v44, %v102_v43  ;;  %v200_v62 = vld [vmem:[#allocation2 + $0x3b0] sm:$0xff]  ;;  %v110_v3 = vld [vmem:[#allocation2 + $0xe0] sm:$0xff]  ;;  %v115_v5 = vld [vmem:[#allocation2 + $0x108] sm:$0xff] }
  0x55   :  { %v112_v4 = vld [vmem:[#allocation2 + $0xf0] sm:$0xff]  ;;  %v117_v6 = vld [vmem:[#allocation2 + $0x118] sm:$0xff]  ;;  %v1059_v7 = vpack.c.bf16 %v200_v62, %v198_v61  ;;  %v207_v11 = vld [vmem:[#allocation2 + $0x3e8] sm:$0xff] }
  0x56   :  { %960 = vmatpush1.bf16.msra.mxu1 %v959_v40  ;;  %v204_v10 = vld [vmem:[#allocation2 + $0x3d0] sm:$0xff]  ;;  %v209_v13 = vld [vmem:[#allocation2 + $0x3f8] sm:$0xff]  ;;  %v973_v14 = vpack.c.bf16 %v117_v6, %v115_v5  ;;  %v114_v15 = vld [vmem:[#allocation2 + $0x100] sm:$0xff] }
  0x57   :  { %1036 = vmatpush1.bf16.msra.mxu0 %v1035_v58  ;;  %962 = vmatprep.subr.bf16.mxu1 %v961_v42  ;;  %v113_v58 = vld [vmem:[#allocation2 + $0xf8] sm:$0xff]  ;;  %v116_v16 = vld [vmem:[#allocation2 + $0x110] sm:$0xff]  ;;  %v119_v17 = vld [vmem:[#allocation2 + $0x128] sm:$0xff]  ;;  %v1065_v20 = vpack.c.bf16 %v209_v13, %v207_v11 }
  0x58   :  { %1038 = vmatprep.subr.bf16.mxu0 %v1037_v63  ;;  %v203_v63 = vld [vmem:[#allocation2 + $0x3c8] sm:$0xff]  ;;  %v969_v2 = vpack.c.bf16 %v113_v58, %v111_v57  ;;  %v121_v18 = vld [vmem:[#allocation2 + $0x138] sm:$0xff]  ;;  %v206_v21 = vld [vmem:[#allocation2 + $0x3e0] sm:$0xff] }
  0x59   :  { %v1061_v8 = vpack.c.bf16 %v205_v1, %v203_v63  ;;  %v208_v22 = vld [vmem:[#allocation2 + $0x3f0] sm:$0xff]  ;;  %v213_v25 = vld [vmem:[#allocation2 + $0x418] sm:$0xff]  ;;  %v977_v26 = vpack.c.bf16 %v121_v18, %v119_v17  ;;  %v118_v27 = vld [vmem:[#allocation2 + $0x120] sm:$0xff] }
  0x5a   :  { %964 = vmatpush1.bf16.msra.mxu1 %v963_v52  ;;  %v120_v28 = vld [vmem:[#allocation2 + $0x130] sm:$0xff]  ;;  %v123_v29 = vld [vmem:[#allocation2 + $0x148] sm:$0xff]  ;;  %v125_v30 = vld [vmem:[#allocation2 + $0x158] sm:$0xff]  ;;  %v1067_v31 = vpack.c.bf16 %v208_v22, %v206_v21 }
  0x5b   :  { %1040 = vmatpush1.bf16.msra.mxu0 %v1039_v9  ;;  %966 = vmatprep.subr.bf16.mxu1 %v965_v54  ;;  %v202_v9 = vld [vmem:[#allocation2 + $0x3c0] sm:$0xff]  ;;  %v212_v34 = vld [vmem:[#allocation2 + $0x410] sm:$0xff]  ;;  %v217_v37 = vld [vmem:[#allocation2 + $0x438] sm:$0xff]  ;;  %v981_v38 = vpack.c.bf16 %v125_v30, %v123_v29 }
  0x5c   :  { %1042 = vmatprep.subr.bf16.mxu0 %v1041_v12  ;;  %v971_v12 = vpack.c.bf16 %v112_v4, %v110_v3  ;;  %v1063_v19 = vpack.c.bf16 %v204_v10, %v202_v9  ;;  %v210_v33 = vld [vmem:[#allocation2 + $0x400] sm:$0xff]  ;;  %v124_v40 = vld [vmem:[#allocation2 + $0x150] sm:$0xff]  ;;  %v127_v41 = vld [vmem:[#allocation2 + $0x168] sm:$0xff] }
  0x5d   :  { %v122_v39 = vld [vmem:[#allocation2 + $0x140] sm:$0xff]  ;;  %v129_v42 = vld [vmem:[#allocation2 + $0x178] sm:$0xff]  ;;  %v70_v43 = vld [vmem:[%s1525_s0 + $0x10] sm:$0xff]  ;;  %v1071_v44 = vpack.c.bf16 %v212_v34, %v210_v33 }
  0x5e   :  { %968 = vmatpush1.bf16.msra.mxu1 %v967_v0  ;;  %v214_v45 = vld [vmem:[#allocation2 + $0x420] sm:$0xff]  ;;  %v983_v49 = vpack.c.bf16 %v124_v40, %v122_v39  ;;  %v78_v50 = vld [vmem:[%s1525_s0 + $0x50] sm:$0xff]  ;;  %v221_v51 = vld [vmem:[#allocation2 + $0x458] sm:$0xff]  ;;  %v985_v52 = vpack.c.bf16 %v129_v42, %v127_v41 }
  0x5f   :  { %1044 = vmatpush1.bf16.msra.mxu0 %v1043_v23  ;;  %970 = vmatprep.subr.bf16.mxu1 %v969_v2  ;;  %v211_v23 = vld [vmem:[#allocation2 + $0x408] sm:$0xff]  ;;  %v126_v53 = vld [vmem:[#allocation2 + $0x160] sm:$0xff]  ;;  %v128_v54 = vld [vmem:[#allocation2 + $0x170] sm:$0xff] }
  0x60   :  { %1046 = vmatprep.subr.bf16.mxu0 %v1045_v24  ;;  %v975_v24 = vpack.c.bf16 %v116_v16, %v114_v15  ;;  %v1069_v32 = vpack.c.bf16 %v213_v25, %v211_v23  ;;  %v131_v55 = vld [vmem:[#allocation2 + $0x188] sm:$0xff]  ;;  %v133_v56 = vld [vmem:[#allocation2 + $0x198] sm:$0xff]  ;;  %v218_v58 = vld [vmem:[#allocation2 + $0x440] sm:$0xff]  ;;  %v987_v0 = vpack.c.bf16 %v128_v54, %v126_v53 }
  0x61   :  { %v220_v62 = vld [vmem:[#allocation2 + $0x450] sm:$0xff]  ;;  %v223_v63 = vld [vmem:[#allocation2 + $0x468] sm:$0xff]  ;;  %v225_v2 = vld [vmem:[#allocation2 + $0x478] sm:$0xff]  ;;  %v989_v3 = vpack.c.bf16 %v133_v56, %v131_v55 }
  0x62   :  { %972 = vmatpush1.bf16.msra.mxu1 %v971_v12  ;;  %v73_v1 = vld [vmem:[%s1525_s0 + $0x28] sm:$0xff]  ;;  %v130_v4 = vld [vmem:[#allocation2 + $0x180] sm:$0xff]  ;;  %v132_v5 = vld [vmem:[#allocation2 + $0x190] sm:$0xff]  ;;  %v1081_v9 = vpack.c.bf16 %v225_v2, %v223_v63 }
  0x63   :  { %1048 = vmatpush1.bf16.msra.mxu0 %v1047_v35  ;;  %974 = vmatprep.subr.bf16.mxu1 %v973_v14  ;;  %v215_v35 = vld [vmem:[#allocation2 + $0x428] sm:$0xff]  ;;  %v222_v10 = vld [vmem:[#allocation2 + $0x460] sm:$0xff]  ;;  %v224_v11 = vld [vmem:[#allocation2 + $0x470] sm:$0xff]  ;;  %v991_v13 = vpack.c.bf16 %v132_v5, %v130_v4 }
  0x64   :  { %1050 = vmatprep.subr.bf16.mxu0 %v1049_v36  ;;  %v979_v36 = vpack.c.bf16 %v120_v28, %v118_v27  ;;  %v1073_v46 = vpack.c.bf16 %v217_v37, %v215_v35  ;;  %v135_v6 = vld [vmem:[#allocation2 + $0x1a8] sm:$0xff]  ;;  %v229_v14 = vld [vmem:[#allocation2 + $0x498] sm:$0xff]  ;;  %v134_v16 = vld [vmem:[#allocation2 + $0x1a0] sm:$0xff] }
  0x65   :  { %v227_v12 = vld [vmem:[#allocation2 + $0x488] sm:$0xff]  ;;  %v136_v17 = vld [vmem:[#allocation2 + $0x1b0] sm:$0xff]  ;;  %v226_v22 = vld [vmem:[#allocation2 + $0x480] sm:$0xff] }
  0x66   :  { %976 = vmatpush1.bf16.msra.mxu1 %v975_v24  ;;  %v139_v18 = vld [vmem:[#allocation2 + $0x1c8] sm:$0xff]  ;;  %v1085_v21 = vpack.c.bf16 %v229_v14, %v227_v12  ;;  %v228_v23 = vld [vmem:[#allocation2 + $0x490] sm:$0xff]  ;;  %v995_v25 = vpack.c.bf16 %v136_v17, %v134_v16  ;;  %v138_v28 = vld [vmem:[#allocation2 + $0x1c0] sm:$0xff] }
  0x67   :  { %1052 = vmatpush1.bf16.msra.mxu0 %v1051_v47  ;;  %978 = vmatprep.subr.bf16.mxu1 %v977_v26  ;;  %v216_v47 = vld [vmem:[#allocation2 + $0x430] sm:$0xff]  ;;  %v231_v24 = vld [vmem:[#allocation2 + $0x4a8] sm:$0xff]  ;;  %v233_v26 = vld [vmem:[#allocation2 + $0x4b8] sm:$0xff] }
  0x68   :  { %1054 = vmatprep.subr.bf16.mxu0 %v1053_v48  ;;  %v219_v48 = vld [vmem:[#allocation2 + $0x448] sm:$0xff]  ;;  %v1075_v57 = vpack.c.bf16 %v216_v47, %v214_v45  ;;  %v140_v29 = vld [vmem:[#allocation2 + $0x1d0] sm:$0xff]  ;;  %v1089_v33 = vpack.c.bf16 %v233_v26, %v231_v24  ;;  %v230_v34 = vld [vmem:[#allocation2 + $0x4a0] sm:$0xff] }
  0x69   :  { %v1077_v61 = vpack.c.bf16 %v221_v51, %v219_v48  ;;  %v143_v30 = vld [vmem:[#allocation2 + $0x1e8] sm:$0xff]  ;;  %v232_v35 = vld [vmem:[#allocation2 + $0x4b0] sm:$0xff]  ;;  %v999_v37 = vpack.c.bf16 %v140_v29, %v138_v28  ;;  %v142_v40 = vld [vmem:[#allocation2 + $0x1e0] sm:$0xff] }
  0x6a   :  { %980 = vmatpush1.bf16.msra.mxu1 %v979_v36  ;;  %v235_v36 = vld [vmem:[#allocation2 + $0x4c8] sm:$0xff]  ;;  %v144_v41 = vld [vmem:[#allocation2 + $0x1f0] sm:$0xff]  ;;  %v616_v56 = vld [vmem:[#allocation5 + $0x38] sm:$0xff] }
  0x6b   :  { %1056 = vmatpush1.bf16.msra.mxu0 %v1055_v59  ;;  %982 = vmatprep.subr.bf16.mxu1 %v981_v38  ;;  %v77_v59 = vld [vmem:[%s1525_s0 + $0x48] sm:$0xff]  ;;  %v237_v38 = vld [vmem:[#allocation2 + $0x4d8] sm:$0xff]  ;;  %v236_v47 = vld [vmem:[#allocation2 + $0x4d0] sm:$0xff]  ;;  %v1003_v48 = vpack.c.bf16 %v144_v41, %v142_v40 }
  0x6c   :  { %1058 = vmatprep.subr.bf16.mxu0 %v1057_v60  ;;  %v69_v60 = vld [vmem:[%s1525_s0 + $0x8] sm:$0xff]  ;;  %v1093_v45 = vpack.c.bf16 %v237_v38, %v235_v36  ;;  %v611_v53 = vld [vmem:[#allocation5 + $0x10] sm:$0xff]  ;;  %v76_v63 = vld [vmem:[%s1525_s0 + $0x40] sm:$0xff] }
  0x6d   :  { %361 = vmatprep.mubr.f32.mxu1 %v69_v60  ;;  %v610_v42 = vld [vmem:[#allocation5 + $0x8] sm:$0xff]  ;;  %v68_v60 = vld [vmem:[%s1525_s0] sm:$0xff]  ;;  %v249_v12 = vld [vmem:[#allocation2 + $0x538] sm:$0xff] }
  0x6e   :  { %984 = vmatpush1.bf16.msra.mxu1 %v983_v49  ;;  %v239_v49 = vld [vmem:[#allocation2 + $0x4e8] sm:$0xff]  ;;  %v613_v2 = vld [vmem:[#allocation5 + $0x20] sm:$0xff]  ;;  %v619_v16 = vld [vmem:[#allocation5 + $0x50] sm:$0xff] }
  0x6f   :  { %1060 = vmatpush1.bf16.msra.mxu0 %v1059_v7  ;;  %986 = vmatprep.subr.bf16.mxu1 %v985_v52  ;;  %v137_v7 = vld [vmem:[#allocation2 + $0x1b8] sm:$0xff]  ;;  %v609_v52 = vld [vmem:[#allocation5] sm:$0xff]  ;;  %v614_v55 = vld [vmem:[#allocation5 + $0x28] sm:$0xff] }
  0x70   :  { %1062 = vmatprep.subr.bf16.mxu0 %v1061_v8  ;;  %v1079_v8 = vpack.c.bf16 %v220_v62, %v218_v58  ;;  %v993_v15 = vpack.c.bf16 %v137_v7, %v135_v6  ;;  %v238_v58 = vld [vmem:[#allocation2 + $0x4e0] sm:$0xff]  ;;  %v245_v62 = vld [vmem:[#allocation2 + $0x518] sm:$0xff]  ;;  %v618_v5 = vld [vmem:[#allocation5 + $0x48] sm:$0xff] }
  0x71   :  { %v620_v6 = vld [vmem:[#allocation5 + $0x58] sm:$0xff]  ;;  %v623_v28 = vld [vmem:[#allocation5 + $0x70] sm:$0xff] }
  0x72   :  { %988 = vmatpush1.bf16.msra.mxu1 %v987_v0  ;;  %v1139_v0 = vpack.c.bf16 %v611_v53, %v609_v52  ;;  %v1145_v14 = vpack.c.bf16 %v620_v6, %v618_v5  ;;  %v253_v24 = vld [vmem:[#allocation2 + $0x558] sm:$0xff]  ;;  %v627_v40 = vld [vmem:[#allocation5 + $0x90] sm:$0xff]  ;;  %v262_v5 = vld [vmem:[#allocation2 + $0x5a0] sm:$0xff] }
  0x73   :  { %1064 = vmatpush1.bf16.msra.mxu0 %v1063_v19  ;;  %990 = vmatprep.subr.bf16.mxu1 %v989_v3  ;;  %v141_v19 = vld [vmem:[#allocation2 + $0x1d8] sm:$0xff]  ;;  %v615_v3 = vld [vmem:[#allocation5 + $0x30] sm:$0xff] }
  0x74   :  { %1066 = vmatprep.subr.bf16.mxu0 %v1065_v20  ;;  %v1083_v20 = vpack.c.bf16 %v224_v11, %v222_v10  ;;  %v997_v27 = vpack.c.bf16 %v141_v19, %v139_v18  ;;  %v75_v10 = vld [vmem:[%s1525_s0 + $0x38] sm:$0xff]  ;;  %v247_v11 = vld [vmem:[#allocation2 + $0x528] sm:$0xff]  ;;  %v631_v52 = vld [vmem:[#allocation5 + $0xb0] sm:$0xff] }
  0x75   :  { %v622_v18 = vld [vmem:[#allocation5 + $0x68] sm:$0xff]  ;;  %v624_v19 = vld [vmem:[#allocation5 + $0x78] sm:$0xff]  ;;  %v264_v6 = vld [vmem:[#allocation2 + $0x5b0] sm:$0xff] }
  0x76   :  { %992 = vmatpush1.bf16.msra.mxu1 %v991_v13  ;;  %v1143_v13 = vpack.c.bf16 %v615_v3, %v613_v2  ;;  %v1149_v26 = vpack.c.bf16 %v624_v19, %v622_v18  ;;  %v257_v36 = vld [vmem:[#allocation2 + $0x578] sm:$0xff]  ;;  %v638_v2 = vld [vmem:[#allocation5 + $0xe8] sm:$0xff]  ;;  %v268_v18 = vld [vmem:[#allocation2 + $0x5d0] sm:$0xff] }
  0x77   :  { %1068 = vmatpush1.bf16.msra.mxu0 %v1067_v31  ;;  %994 = vmatprep.subr.bf16.mxu1 %v993_v15  ;;  %v145_v31 = vld [vmem:[#allocation2 + $0x1f8] sm:$0xff]  ;;  %v617_v15 = vld [vmem:[#allocation5 + $0x40] sm:$0xff]  ;;  %v271_v19 = vld [vmem:[#allocation2 + $0x5e8] sm:$0xff] }
  0x78   :  { %1070 = vmatprep.subr.bf16.mxu0 %v1069_v32  ;;  %v1087_v32 = vpack.c.bf16 %v228_v23, %v226_v22  ;;  %v1001_v39 = vpack.c.bf16 %v145_v31, %v143_v30  ;;  %v248_v22 = vld [vmem:[#allocation2 + $0x530] sm:$0xff]  ;;  %v251_v23 = vld [vmem:[#allocation2 + $0x548] sm:$0xff]  ;;  %v628_v31 = vld [vmem:[#allocation5 + $0x98] sm:$0xff] }
  0x79   :  { %v626_v30 = vld [vmem:[#allocation5 + $0x88] sm:$0xff]  ;;  %v640_v3 = vld [vmem:[#allocation5 + $0xf8] sm:$0xff] }
  0x7a   :  { %439 = vmatmul.mubr.f32.vlgmr.msra.gmra.mrb[0].mxu0 %v70_v43  ;;  %996 = vmatpush1.bf16.msra.mxu1 %v995_v25  ;;  %v612_v43 = vld [vmem:[#allocation5 + $0x18] sm:$0xff]  ;;  %v1147_v25 = vpack.c.bf16 %v619_v16, %v617_v15  ;;  %v1153_v38 = vpack.c.bf16 %v628_v31, %v626_v30  ;;  %v272_v30 = vld [vmem:[#allocation2 + $0x5f0] sm:$0xff]  ;;  %v275_v31 = vld [vmem:[#allocation2 + $0x608] sm:$0xff] }
  0x7b   :  { %1072 = vmatpush1.bf16.msra.mxu0 %v1071_v44  ;;  %444 = vmatprep.mubr.f32.mxu0 %v78_v50  ;;  %v1091_v44 = vpack.c.bf16 %v232_v35, %v230_v34  ;;  %v241_v50 = vld [vmem:[#allocation2 + $0x4f8] sm:$0xff]  ;;  %v1137_v51 = vpack.c.bf16 %v612_v43, %v610_v42  ;;  %v252_v34 = vld [vmem:[#allocation2 + $0x550] sm:$0xff]  ;;  %v255_v35 = vld [vmem:[#allocation2 + $0x568] sm:$0xff] }
  0x7c   :  { %1074 = vmatprep.subr.bf16.mxu0 %v1073_v46  ;;  %998 = vmatprep.subr.bf16.mxu1 %v997_v27  ;;  %v234_v46 = vld [vmem:[#allocation2 + $0x4c0] sm:$0xff]  ;;  %v630_v42 = vld [vmem:[#allocation5 + $0xa8] sm:$0xff]  ;;  %v632_v43 = vld [vmem:[#allocation5 + $0xb8] sm:$0xff] }
  0x7d   :  { %v1095_v54 = vpack.c.bf16 %v236_v47, %v234_v46  ;;  %v621_v27 = vld [vmem:[#allocation5 + $0x60] sm:$0xff]  ;;  %v256_v46 = vld [vmem:[#allocation2 + $0x570] sm:$0xff]  ;;  %v259_v47 = vld [vmem:[#allocation2 + $0x588] sm:$0xff] }
  0x7e   :  { %445 = vmatmul.mubr.f32.gmra.mrb[2].mxu0 %v77_v59  ;;  %1000 = vmatpush1.bf16.msra.mxu1 %v999_v37  ;;  %v240_v59 = vld [vmem:[#allocation2 + $0x4f0] sm:$0xff]  ;;  %v1151_v37 = vpack.c.bf16 %v623_v28, %v621_v27  ;;  %v644_v15 = vld [vmem:[#allocation5 + $0x118] sm:$0xff] }
  0x7f   :  { %1076 = vmatpush1.bf16.msra.mxu0 %v1075_v57  ;;  %515 = vmatprep.mubr.f32.mxu0 %v73_v1  ;;  %v1097_v57 = vpack.c.bf16 %v241_v50, %v239_v49  ;;  %v1141_v1 = vpack.c.bf16 %v616_v56, %v614_v55  ;;  %v1099_v4 = vpack.c.bf16 %v240_v59, %v238_v58  ;;  %v636_v55 = vld [vmem:[#allocation5 + $0xd8] sm:$0xff]  ;;  %v260_v58 = vld [vmem:[#allocation2 + $0x590] sm:$0xff]  ;;  %v263_v59 = vld [vmem:[#allocation2 + $0x5a8] sm:$0xff] }
  0x80   :  { %1078 = vmatprep.subr.bf16.mxu0 %v1077_v61  ;;  %1002 = vmatprep.subr.bf16.mxu1 %v1001_v39  ;;  %v243_v61 = vld [vmem:[#allocation2 + $0x508] sm:$0xff]  ;;  %v625_v39 = vld [vmem:[#allocation5 + $0x80] sm:$0xff]  ;;  %v1157_v50 = vpack.c.bf16 %v632_v43, %v630_v42  ;;  %v648_v27 = vld [vmem:[#allocation5 + $0x138] sm:$0xff] }
  0x81   :  { %v1101_v7 = vpack.c.bf16 %v245_v62, %v243_v61  ;;  %v1155_v49 = vpack.c.bf16 %v627_v40, %v625_v39  ;;  %v652_v39 = vld [vmem:[#allocation5 + $0x158] sm:$0xff]  ;;  %v276_v42 = vld [vmem:[#allocation2 + $0x610] sm:$0xff] }
  0x82   :  { %1004 = vmatpush1.bf16.msra.mxu1 %v1003_v48  ;;  %v261_v48 = vld [vmem:[#allocation2 + $0x598] sm:$0xff] }
  0x83   :  { %1080 = vmatpush1.bf16.msra.mxu0 %v1079_v8  ;;  %1138 = vmatprep.subr.bf16.mxu1 %v1137_v51  ;;  %v242_v8 = vld [vmem:[#allocation2 + $0x500] sm:$0xff]  ;;  %v1117_v56 = vpack.c.bf16 %v261_v48, %v259_v47 }
  0x84   :  { %1082 = vmatprep.subr.bf16.mxu0 %v1081_v9  ;;  %v244_v9 = vld [vmem:[#allocation2 + $0x510] sm:$0xff]  ;;  %v629_v51 = vld [vmem:[#allocation5 + $0xa0] sm:$0xff] }
  0x85   :  { %362 = vmatmul.mubr.f32.vlgmr.msra.gmra.mrb[0].mxu1 %v68_v60  ;;  %v1103_v17 = vpack.c.bf16 %v244_v9, %v242_v8  ;;  %v265_v60 = vld [vmem:[#allocation2 + $0x5b8] sm:$0xff]  ;;  %v1159_v61 = vpack.c.bf16 %v631_v52, %v629_v51  ;;  %v72_v47 = vld [vmem:[%s1525_s0 + $0x20] sm:$0xff] }
  0x86   :  { %367 = vmatprep.mubr.f32.mxu1 %v76_v63  ;;  %1140 = vmatpush1.bf16.msra.mxu1 %v1139_v0  ;;  %v633_v63 = vld [vmem:[#allocation5 + $0xc0] sm:$0xff]  ;;  %v635_v0 = vld [vmem:[#allocation5 + $0xd0] sm:$0xff]  ;;  %v269_v8 = vld [vmem:[#allocation2 + $0x5d8] sm:$0xff] }
  0x87   :  { %1084 = vmatpush1.bf16.msra.mxu0 %v1083_v20  ;;  %1142 = vmatprep.subr.bf16.mxu1 %v1141_v1  ;;  %v1105_v20 = vpack.c.bf16 %v249_v12, %v247_v11  ;;  %v1163_v9 = vpack.c.bf16 %v635_v0, %v633_v63  ;;  %v637_v11 = vld [vmem:[#allocation5 + $0xe0] sm:$0xff]  ;;  %v639_v12 = vld [vmem:[#allocation5 + $0xf0] sm:$0xff]  ;;  %v1359_v63 = vmov 0.0  }
  0x88   :  { %1086 = vmatprep.subr.bf16.mxu0 %v1085_v21  ;;  %v246_v21 = vld [vmem:[#allocation2 + $0x520] sm:$0xff]  ;;  %v74_v0 = vld [vmem:[%s1525_s0 + $0x30] sm:$0xff] }
  0x89   :  { %368 = vmatmul.mubr.f32.gmra.mrb[2].mxu1 %v75_v10  ;;  %v1107_v29 = vpack.c.bf16 %v248_v22, %v246_v21  ;;  %v1165_v10 = vpack.c.bf16 %v640_v3, %v638_v2  ;;  %v1167_v21 = vpack.c.bf16 %v639_v12, %v637_v11  ;;  %v80_v51 = vld [vmem:[%s1525_s0 + $0x60] sm:$0xff]  ;;  %v664_v2 = vld [vmem:[#allocation5 + $0x1b8] sm:$0xff] }
  0x8a   :  { %1144 = vmatpush1.bf16.msra.mxu1 %v1143_v13  ;;  %v1123_v13 = vpack.c.bf16 %v264_v6, %v262_v5  ;;  %v661_v5 = vld [vmem:[#allocation5 + $0x1a0] sm:$0xff]  ;;  %v663_v6 = vld [vmem:[#allocation5 + $0x1b0] sm:$0xff] }
  0x8b   :  { %1088 = vmatpush1.bf16.msra.mxu0 %v1087_v32  ;;  %1146 = vmatprep.subr.bf16.mxu1 %v1145_v14  ;;  %v1109_v32 = vpack.c.bf16 %v253_v24, %v251_v23  ;;  %v642_v14 = vld [vmem:[#allocation5 + $0x108] sm:$0xff]  ;;  %v641_v23 = vld [vmem:[#allocation5 + $0x100] sm:$0xff]  ;;  %v643_v24 = vld [vmem:[#allocation5 + $0x110] sm:$0xff] }
  0x8c   :  { %1090 = vmatprep.subr.bf16.mxu0 %v1089_v33  ;;  %v250_v33 = vld [vmem:[#allocation2 + $0x540] sm:$0xff]  ;;  %v1169_v22 = vpack.c.bf16 %v644_v15, %v642_v14  ;;  %v670_v15 = vld [vmem:[#allocation5 + $0x1e8] sm:$0xff] }
  0x8d   :  { %v1111_v41 = vpack.c.bf16 %v252_v34, %v250_v33  ;;  %v1171_v33 = vpack.c.bf16 %v643_v24, %v641_v23  ;;  %v665_v12 = vld [vmem:[#allocation5 + $0x1c0] sm:$0xff] }
  0x8e   :  { %1148 = vmatpush1.bf16.msra.mxu1 %v1147_v25 }
  0x8f   :  { %1092 = vmatpush1.bf16.msra.mxu0 %v1091_v44  ;;  %1150 = vmatprep.subr.bf16.mxu1 %v1149_v26  ;;  %v1113_v44 = vpack.c.bf16 %v257_v36, %v255_v35  ;;  %v646_v26 = vld [vmem:[#allocation5 + $0x128] sm:$0xff]  ;;  %v645_v35 = vld [vmem:[#allocation5 + $0x120] sm:$0xff]  ;;  %v647_v36 = vld [vmem:[#allocation5 + $0x130] sm:$0xff] }
  0x90   :  { %1094 = vmatprep.subr.bf16.mxu0 %v1093_v45  ;;  %v254_v45 = vld [vmem:[#allocation2 + $0x560] sm:$0xff]  ;;  %v1173_v34 = vpack.c.bf16 %v648_v27, %v646_v26  ;;  %v1175_v43 = vpack.c.bf16 %v647_v36, %v645_v35 }
  0x91   :  { %v1115_v53 = vpack.c.bf16 %v256_v46, %v254_v45  ;;  %v649_v45 = vld [vmem:[#allocation5 + $0x140] sm:$0xff]  ;;  %v651_v46 = vld [vmem:[#allocation5 + $0x150] sm:$0xff] }
  0x92   :  { %1152 = vmatpush1.bf16.msra.mxu1 %v1151_v37  ;;  %v1179_v52 = vpack.c.bf16 %v651_v46, %v649_v45  ;;  %v784_v45 = vld [vmem:[#allocation7 + $0x90] sm:$0xff]  ;;  %v785_v46 = vld [vmem:[#allocation7 + $0x98] sm:$0xff] }
  0x93   :  { %1096 = vmatpush1.bf16.msra.mxu0 %v1095_v54  ;;  %1154 = vmatprep.subr.bf16.mxu1 %v1153_v38  ;;  %v634_v54 = vld [vmem:[#allocation5 + $0xc8] sm:$0xff] }
  0x94   :  { %1098 = vmatprep.subr.bf16.mxu0 %v1097_v57  ;;  %v258_v57 = vld [vmem:[#allocation2 + $0x580] sm:$0xff]  ;;  %v1161_v62 = vpack.c.bf16 %v636_v55, %v634_v54  ;;  %v650_v38 = vld [vmem:[#allocation5 + $0x148] sm:$0xff]  ;;  %v655_v55 = vld [vmem:[#allocation5 + $0x170] sm:$0xff] }
  0x95   :  { %v1119_v1 = vpack.c.bf16 %v260_v58, %v258_v57  ;;  %v653_v54 = vld [vmem:[#allocation5 + $0x160] sm:$0xff]  ;;  %v658_v57 = vld [vmem:[#allocation5 + $0x188] sm:$0xff]  ;;  %v660_v58 = vld [vmem:[#allocation5 + $0x198] sm:$0xff] }
  0x96   :  { %1156 = vmatpush1.bf16.msra.mxu1 %v1155_v49  ;;  %v654_v49 = vld [vmem:[#allocation5 + $0x168] sm:$0xff] }
  0x97   :  { %1100 = vmatpush1.bf16.msra.mxu0 %v1099_v4  ;;  %1158 = vmatprep.subr.bf16.mxu1 %v1157_v50  ;;  %v1121_v4 = vpack.c.bf16 %v265_v60, %v263_v59  ;;  %v656_v50 = vld [vmem:[#allocation5 + $0x178] sm:$0xff]  ;;  %v1183_v59 = vpack.c.bf16 %v655_v55, %v653_v54  ;;  %v1185_v60 = vpack.c.bf16 %v660_v58, %v658_v57  ;;  %v768_v54 = vld [vmem:[#allocation7 + $0x10] sm:$0xff]  ;;  %v786_v57 = vld [vmem:[#allocation7 + $0xa0] sm:$0xff] }
  0x98   :  { %1102 = vmatprep.subr.bf16.mxu0 %v1101_v7  ;;  %v267_v7 = vld [vmem:[#allocation2 + $0x5c8] sm:$0xff]  ;;  %v769_v55 = vld [vmem:[#allocation7 + $0x18] sm:$0xff] }
  0x99   :  { %v1125_v16 = vpack.c.bf16 %v269_v8, %v267_v7  ;;  %v81_v7 = vld [vmem:[%s1525_s0 + $0x68] sm:$0xff]  ;;  %v1191_v8 = vpack.c.bf16 %v663_v6, %v661_v5  ;;  %v772_v5 = vld [vmem:[#allocation7 + $0x30] sm:$0xff]  ;;  %v773_v6 = vld [vmem:[#allocation7 + $0x38] sm:$0xff] }
  0x9a   :  { %1160 = vmatpush1.bf16.msra.mxu1 %v1159_v61  ;;  %v657_v61 = vld [vmem:[#allocation5 + $0x180] sm:$0xff]  ;;  %v787_v58 = vld [vmem:[#allocation7 + $0xa8] sm:$0xff] }
  0x9b   :  { %1104 = vmatpush1.bf16.msra.mxu0 %v1103_v17  ;;  %1162 = vmatprep.subr.bf16.mxu1 %v1161_v62  ;;  %v266_v17 = vld [vmem:[#allocation2 + $0x5c0] sm:$0xff]  ;;  %v659_v62 = vld [vmem:[#allocation5 + $0x190] sm:$0xff] }
  0x9c   :  { %1106 = vmatprep.subr.bf16.mxu0 %v1105_v20  ;;  %v273_v20 = vld [vmem:[#allocation2 + $0x5f8] sm:$0xff]  ;;  %v1127_v25 = vpack.c.bf16 %v268_v18, %v266_v17  ;;  %v1187_v3 = vpack.c.bf16 %v659_v62, %v657_v61  ;;  %v669_v18 = vld [vmem:[#allocation5 + $0x1e0] sm:$0xff]  ;;  %v1209_v62 = vpack.c.bf16 %v787_v58, %v786_v57 }
  0x9d   :  { %v1129_v28 = vpack.c.bf16 %v273_v20, %v271_v19  ;;  %v671_v19 = vld [vmem:[#allocation5 + $0x1f0] sm:$0xff] }
  0x9e   :  { %1164 = vmatpush1.bf16.msra.mxu1 %v1163_v9  ;;  %v666_v9 = vld [vmem:[#allocation5 + $0x1c8] sm:$0xff]  ;;  %v1199_v20 = vpack.c.bf16 %v671_v19, %v669_v18  ;;  %v777_v18 = vld [vmem:[#allocation7 + $0x58] sm:$0xff]  ;;  %v794_v19 = vld [vmem:[#allocation7 + $0xe0] sm:$0xff] }
  0x9f   :  { %1108 = vmatpush1.bf16.msra.mxu0 %v1107_v29  ;;  %1166 = vmatprep.subr.bf16.mxu1 %v1165_v10  ;;  %v270_v29 = vld [vmem:[#allocation2 + $0x5e0] sm:$0xff]  ;;  %v668_v10 = vld [vmem:[#allocation5 + $0x1d8] sm:$0xff] }
  0xa0   :  { %1110 = vmatprep.subr.bf16.mxu0 %v1109_v32  ;;  %v277_v32 = vld [vmem:[#allocation2 + $0x618] sm:$0xff]  ;;  %v1131_v37 = vpack.c.bf16 %v272_v30, %v270_v29  ;;  %v1193_v11 = vpack.c.bf16 %v668_v10, %v666_v9  ;;  %v1215_v9 = vpack.c.bf16 %v773_v6, %v772_v5 }
  0xa1   :  { %v1133_v40 = vpack.c.bf16 %v277_v32, %v275_v31  ;;  %v278_v31 = vld [vmem:[%s1527_s2] sm:$0x3] }
  0xa2   :  { %1168 = vmatpush1.bf16.msra.mxu1 %v1167_v21  ;;  %v782_v21 = vld [vmem:[#allocation7 + $0x80] sm:$0xff] }
  0xa3   :  { %1112 = vmatpush1.bf16.msra.mxu0 %v1111_v41  ;;  %1170 = vmatprep.subr.bf16.mxu1 %v1169_v22  ;;  %v274_v41 = vld [vmem:[#allocation2 + $0x600] sm:$0xff]  ;;  %v783_v22 = vld [vmem:[#allocation7 + $0x88] sm:$0xff] }
  0xa4   :  { %1114 = vmatprep.subr.bf16.mxu0 %v1113_v44  ;;  %v1177_v44 = vpack.c.bf16 %v652_v39, %v650_v38  ;;  %v1135_v48 = vpack.c.bf16 %v276_v42, %v274_v41  ;;  %v1201_v23 = vpack.c.bf16 %v783_v22, %v782_v21  ;;  %v766_v41 = vld [vmem:[#allocation7] sm:$0xff]  ;;  %v767_v42 = vld [vmem:[#allocation7 + $0x8] sm:$0xff] }
  0xa6   :  { %1172 = vmatpush1.bf16.msra.mxu1 %v1171_v33 }
  0xa7   :  { %1116 = vmatpush1.bf16.msra.mxu0 %v1115_v53  ;;  %1174 = vmatprep.subr.bf16.mxu1 %v1173_v34  ;;  %v1181_v53 = vpack.c.bf16 %v656_v50, %v654_v49  ;;  %v1203_v49 = vpack.c.bf16 %v767_v42, %v766_v41 }
  0xa8   :  { %1118 = vmatprep.subr.bf16.mxu0 %v1117_v56  ;;  %v79_v56 = vld [vmem:[%s1525_s0 + $0x58] sm:$0xff] }
  0xaa   :  { %1176 = vmatpush1.bf16.msra.mxu1 %v1175_v43 }
  0xab   :  { %1120 = vmatpush1.bf16.msra.mxu0 %v1119_v1  ;;  %1178 = vmatprep.subr.bf16.mxu1 %v1177_v44  ;;  %v662_v1 = vld [vmem:[#allocation5 + $0x1a8] sm:$0xff] }
  0xac   :  { %1122 = vmatprep.subr.bf16.mxu0 %v1121_v4  ;;  %v1189_v4 = vpack.c.bf16 %v664_v2, %v662_v1  ;;  %v788_v1 = vld [vmem:[#allocation7 + $0xb0] sm:$0xff]  ;;  %v789_v2 = vld [vmem:[#allocation7 + $0xb8] sm:$0xff] }
  0xae   :  { %1180 = vmatpush1.bf16.msra.mxu1 %v1179_v52 }
  0xaf   :  { %1124 = vmatpush1.bf16.msra.mxu0 %v1123_v13  ;;  %1182 = vmatprep.subr.bf16.mxu1 %v1181_v53  ;;  %v667_v13 = vld [vmem:[#allocation5 + $0x1d0] sm:$0xff]  ;;  %v1205_v53 = vpack.c.bf16 %v785_v46, %v784_v45 }
  0xb0   :  { %1126 = vmatprep.subr.bf16.mxu0 %v1125_v16  ;;  %v1195_v14 = vpack.c.bf16 %v667_v13, %v665_v12  ;;  %v672_v16 = vld [vmem:[#allocation5 + $0x1f8] sm:$0xff]  ;;  %v775_v12 = vld [vmem:[#allocation7 + $0x48] sm:$0xff]  ;;  %v792_v13 = vld [vmem:[#allocation7 + $0xd0] sm:$0xff] }
  0xb1   :  { %v1197_v17 = vpack.c.bf16 %v672_v16, %v670_v15 }
  0xb2   :  { %1184 = vmatpush1.bf16.msra.mxu1 %v1183_v59 }
  0xb3   :  { %1128 = vmatpush1.bf16.msra.mxu0 %v1127_v25  ;;  %1186 = vmatprep.subr.bf16.mxu1 %v1185_v60  ;;  %v1207_v60 = vpack.c.bf16 %v769_v55, %v768_v54 }
  0xb4   :  { %1130 = vmatprep.subr.bf16.mxu0 %v1129_v28  ;;  %v280_v28 = vlaneseq }
  0xb6   :  { %1188 = vmatpush1.bf16.msra.mxu1 %v1187_v3  ;;  %v1489_v29 = vshrl.u32 %v280_v28, 7 }
  0xb7   :  { %1132 = vmatpush1.bf16.msra.mxu0 %v1131_v37  ;;  %1190 = vmatprep.subr.bf16.mxu1 %v1189_v4  ;;  %v1213_v4 = vpack.c.bf16 %v789_v2, %v788_v1 }
  0xb8   :  { %1134 = vmatprep.subr.bf16.mxu0 %v1133_v40  ;;  %v282_v30 = vsub.s32 0, %v1489_v29  ;;  %v286_v32 = vsub.s32 1, %v1489_v29  ;;  %v902_v29 = vld [vmem:[%s1531_s6] ss:$0 sm:$0xff] }
  0xba   :  { %516 = vmatmul.mubr.f32.vlgmr.msra.gmra.mrb[0].mxu0 %v72_v47  ;;  %1192 = vmatpush1.bf16.msra.mxu1 %v1191_v8  ;;  %v283_v33 = vrot.slane %v278_v31, %v282_v30  ;;  %v287_v34 = vrot.slane %v278_v31, %v286_v32  ;;  %v791_v8 = vld [vmem:[#allocation7 + $0xc8] sm:$0xff]  ;;  %v780_v31 = vld [vmem:[#allocation7 + $0x70] sm:$0xff] }
  0xbb   :  { %1136 = vmatpush1.bf16.msra.mxu0 %v1135_v48  ;;  %521 = vmatprep.mubr.f32.mxu0 %v80_v51 }
  0xbc   :  { %1194 = vmatprep.subr.bf16.mxu1 %v1193_v11  ;;  %v774_v11 = vld [vmem:[#allocation7 + $0x40] sm:$0xff] }
  0xbd   :  { %v1219_v15 = vpack.c.bf16 %v775_v12, %v774_v11 }
  0xbe   :  { %522 = vmatmul.mubr.f32.gmra.mrb[2].mxu0 %v79_v56  ;;  %1196 = vmatpush1.bf16.msra.mxu1 %v1195_v14  ;;  %v793_v14 = vld [vmem:[#allocation7 + $0xd8] sm:$0xff] }
  0xbf   :  { %592 = vmatprep.mubr.f32.mxu0 %v1359_v63  ;;  %1198 = vmatprep.subr.bf16.mxu1 %v1197_v17  ;;  %v1221_v16 = vpack.c.bf16 %v793_v14, %v792_v13  ;;  %v776_v17 = vld [vmem:[#allocation7 + $0x50] sm:$0xff] }
  0xc0   :  { %v1223_v21 = vpack.c.bf16 %v777_v18, %v776_v17 }
  0xc2   :  { %900 = vmatmul.mubr.msk.f32.vlgmr.msra.gmra.mrb[0].mxu0 %vm290_vm0, %v74_v0  ;;  %1200 = vmatpush1.bf16.msra.mxu1 %v1199_v20  ;;  %v771_v0 = vld [vmem:[#allocation7 + $0x28] sm:$0xff] }
  0xc3   :  { %598 = vmatprep.mubr.f32.mxu0 %v1359_v63  ;;  %1202 = vmatprep.subr.bf16.mxu1 %v1201_v23  ;;  %v770_v63 = vld [vmem:[#allocation7 + $0x20] sm:$0xff]  ;;  %v795_v20 = vld [vmem:[#allocation7 + $0xe8] sm:$0xff] }
  0xc4   :  { %v1211_v3 = vpack.c.bf16 %v771_v0, %v770_v63  ;;  %v1225_v22 = vpack.c.bf16 %v795_v20, %v794_v19  ;;  %v778_v23 = vld [vmem:[#allocation7 + $0x60] sm:$0xff] }
  0xc6   :  { %901 = vmatmul.mubr.msk.f32.gmra.mrb[2].mxu0 %vm290_vm0, %v81_v7  ;;  %v790_v7 = vld [vmem:[#allocation7 + $0xc0] sm:$0xff] }
  0xc7   :  { %v1217_v10 = vpack.c.bf16 %v791_v8, %v790_v7 }
 0x158   :  { %v363_v24 = vpop.f32.mrb[0].mxu1 }
 0x159   :  { %v365_v25 = vpop.f32.mrb[1].mxu1  ;;  %v364_v35 = vadd.f32 %v363_v24, %v283_v33  ;;  %v779_v24 = vld [vmem:[#allocation7 + $0x68] sm:$0xff] }
 0x15a   :  { %v366_v36 = vadd.f32 %v365_v25, %v287_v34  ;;  %v1227_v25 = vpack.c.bf16 %v779_v24, %v778_v23 }
 0x15c   :  { %v369_v26 = vpop.f32.mrb[2].mxu1 }
 0x15d   :  { %v371_v27 = vpop.f32.mrb[3].mxu1  ;;  %v370_v40 = vadd.f32 %v369_v26, %v283_v33  ;;  %v796_v26 = vld [vmem:[#allocation7 + $0xf0] sm:$0xff]  ;;  %v781_v33 = vld [vmem:[#allocation7 + $0x78] sm:$0xff] }
 0x15e   :  { %v372_v44 = vadd.f32 %v371_v27, %v287_v34  ;;  %v797_v27 = vld [vmem:[#allocation7 + $0xf8] sm:$0xff]  ;;  %v1231_v34 = vpack.c.bf16 %v781_v33, %v780_v31 }
 0x15f   :  { %v1229_v28 = vpack.c.bf16 %v797_v27, %v796_v26 }
 0x195   :  { %v594_v37 = vpop.f32.mrb[0].mxu0 }
 0x196   :  { %v1234_v38 = vadd.f32 %v594_v37, %v364_v35  ;;  %v596_v39 = vpop.f32.mrb[1].mxu0  ;;  %v673_v35 = vld [vmem:[%s1529_s4] sm:$0x3] }
 0x197   :  { %v1236_v43 = vadd.f32 %v596_v39, %v366_v36  ;;  %v678_v36 = vrot.slane %v673_v35, %v282_v30  ;;  %v682_v37 = vrot.slane %v673_v35, %v286_v32 }
 0x198   :  { %v605_v50 = vmax.f32 %v1234_v38, 0.0 }
 0x199   :  { %v606_v47 = vmax.f32 %v1236_v43, 0.0  ;;  %v600_v48 = vpop.f32.mrb[2].mxu0 }
 0x19a   :  { %v1238_v51 = vadd.f32 %v600_v48, %v370_v40  ;;  %v602_v52 = vpop.f32.mrb[3].mxu0 }
 0x19b   :  { %v1240_v56 = vadd.f32 %v602_v52, %v372_v44  ;;  %749 = vmatprep.mubr.f32.mxu1 %v606_v47 }
 0x19c   :  { %750 = vmatmul.mubr.f32.vlgmr.msra.gmra.mrb[4].mxu1 %v605_v50  ;;  %v607_v61 = vmax.f32 %v1238_v51, 0.0 }
 0x19d   :  { %v608_v59 = vmax.f32 %v1240_v56, 0.0  ;;  %1204 = vmatpush3.bf16.msra.mxu1 %v1203_v49 }
 0x19e   :  { %1206 = vmatprep.subr.bf16.mxu1 %v1205_v53 }
 0x19f   :  { %755 = vmatprep.mubr.f32.mxu1 %v608_v59 }
 0x1a0   :  { %756 = vmatmul.mubr.f32.gmra.mrb[6].mxu1 %v607_v61 }
 0x1a1   :  { %1208 = vmatpush3.bf16.msra.mxu1 %v1207_v60 }
 0x1a2   :  { %1210 = vmatprep.subr.bf16.mxu1 %v1209_v62 }
 0x1a5   :  { %1212 = vmatpush3.bf16.msra.mxu1 %v1211_v3 }
 0x1a6   :  { %1214 = vmatprep.subr.bf16.mxu1 %v1213_v4 }
 0x1a9   :  { %1216 = vmatpush3.bf16.msra.mxu1 %v1215_v9 }
 0x1aa   :  { %1218 = vmatprep.subr.bf16.mxu1 %v1217_v10 }
 0x1ad   :  { %1220 = vmatpush3.bf16.msra.mxu1 %v1219_v15 }
 0x1ae   :  { %1222 = vmatprep.subr.bf16.mxu1 %v1221_v16 }
 0x1b1   :  { %1224 = vmatpush3.bf16.msra.mxu1 %v1223_v21 }
 0x1b2   :  { %1226 = vmatprep.subr.bf16.mxu1 %v1225_v22 }
 0x1b5   :  { %1228 = vmatpush3.bf16.msra.mxu1 %v1227_v25 }
 0x1b6   :  { %1230 = vmatprep.subr.bf16.mxu1 %v1229_v28 }
 0x1b9   :  { %1232 = vmatpush3.bf16.msra.mxu1 %v1231_v34 }
 0x26f   :  { %v751_v38 = vpop.f32.mrb[4].mxu1 }
 0x270   :  { %v752_v39 = vadd.f32 %v751_v38, %v678_v36  ;;  %v753_v40 = vpop.f32.mrb[5].mxu1 }
 0x271   :  { %v754_v41 = vadd.f32 %v753_v40, %v682_v37 }
 0x272   :  { %v762_v44 = vmax.f32 %v752_v39, 0.0 }
 0x273   :  { %v763_v42 = vmax.f32 %v754_v41, 0.0  ;;  %v757_v43 = vpop.f32.mrb[6].mxu1 }
 0x274   :  { %v758_v45 = vadd.f32 %v757_v43, %v678_v36  ;;  %v759_v46 = vpop.f32.mrb[7].mxu1 }
 0x275   :  { %v760_v47 = vadd.f32 %v759_v46, %v682_v37  ;;  %869 = vmatprep.mubr.f32.mxu1 %v763_v42 }
 0x276   :  { %870 = vmatmul.mubr.f32.vlgmr.msra.gmra.mrb[8].mxu1 %v762_v44  ;;  %v764_v49 = vmax.f32 %v758_v45, 0.0 }
 0x277   :  { %v765_v48 = vmax.f32 %v760_v47, 0.0 }
 0x279   :  { %874 = vmatprep.mubr.f32.mxu1 %v765_v48 }
 0x27a   :  { %875 = vmatmul.mubr.f32.gmra.mrb[10].mxu1 %v764_v49 }
 0x349   :  { %v935_v30 = vpop.f32.mrb[8].mxu1 }
 0x34a   :  { %v936_v32 = vpop.f32.mrb[9].mxu1 }
 0x34b   :  { %v937_v50 = vadd.f32 %v936_v32, %v935_v30 }
 0x34d   :  { %v872_v51 = vadd.f32 %v937_v50, %v902_v29  ;;  %v938_v52 = vpop.f32.mrb[10].mxu1 }
 0x34e   :  { %v939_v53 = vpop.f32.mrb[11].mxu1 }
 0x34f   :  { %880 = vst [vmem:[#allocation8] sm:$0xff] %v872_v51  ;;  %v940_v54 = vadd.f32 %v939_v53, %v938_v52 }
 0x351   :  { %v877_v55 = vadd.f32 %v940_v54, %v902_v29 }
 0x353   :  { %881 = vst [vmem:[#allocation8 + $0x8] sm:$0xff] %v877_v55 }
 0x354   :  { %1335 = shalt.err (!%p1332_p0)
}
 0x355   :  { %s1336_s25 = scalar_lea.hbm %s1532_s7, 256 }
 0x356   :  { %p1337_p1 = scmp.ne.s32.totalorder %s1532_s7, %s1336_s25  ;;  %p1340_p2 = scmp.lt.u32.totalorder %s1336_s25, %s1532_s7 }
 0x358   :  { %p1342_p3 = pnand %p1340_p2, %p1337_p1 }
 0x35a   :  { %1345 = shalt.err (!%p1342_p3)
}
 0x35b   :  { %893 = dma.vmem_to_hbm [thread:$0]  %s888_s23, 256, %s1532_s7, [#allocation4], %s1357_s1, %s1357_s1, %s1358_s27  }
 0x35c   :  { %1350 = dma.done.wait [#allocation4], 256  }
 0x35d   :  { %1351 = vsyncadd [#allocation4], 4294967040 }
 0x35e   :  { %897 = vsyncpa [#allocation3], 1 }
 0x35f   :  { %898 = vsyncpa [#allocation6], 1 }
 0x360   :  { %899 = vsyncpa [#allocation4], 1 }

</bundles_post_ra>
